<compile_context>
chip_gen: v7x
topology: tpu7x:2x2x1
jax: 0.10.0
libtpu: 0.0.40
codegen_flags: <defaults>
</compile_context>

<pallas_src>
import jax
import jax.numpy as jnp
from jax.experimental import pallas as pl
from jax.experimental.pallas import tpu as pltpu


def _catconv_kernel(p_ref, w_ref, b_ref, out_ref):
    """One fused matmul per batch element.

    p_ref:  (1, Ktot, HWo)   im2col patches (x-taps then y-taps along Ktot)
    w_ref:  (Ctot, Ktot)     block-diagonal fused weight
    b_ref:  (Ctot, 1)        fused bias column
    out_ref:(1, Ctot, HWo)   concatenated conv outputs (NCHW, spatial flattened)
    """
    p = p_ref[0, :, :].astype(jnp.float32)                 # (Ktot, HWo)
    w = w_ref[...].astype(jnp.float32)                     # (Ctot, Ktot)
    acc = jnp.dot(w, p, preferred_element_type=jnp.float32)  # (Ctot, HWo)
    acc = acc + b_ref[...].astype(jnp.float32)             # (Ctot, 1) bcast
    out_ref[0, :, :] = acc.astype(out_ref.dtype)


def cat_conv(x, y, w1, b1, w2, b2, pad1=1, pad2=1):
    """x, y: NCHW float32. w*: OIHW (Cout, Cin, KH, KW). b*: (Cout,).
    Returns NCHW (N, C1+C2, Hout, Wout) — same semantics as CatConv.forward."""
    N, Cin1, H, W = x.shape
    Ny, Cin2, Hy, Wy = y.shape
    C1, _, KH1, KW1 = w1.shape
    C2, _, KH2, KW2 = w2.shape
    Hout = H + 2 * pad1 - KH1 + 1
    Wout = W + 2 * pad1 - KW1 + 1
    Hout2 = Hy + 2 * pad2 - KH2 + 1
    Wout2 = Wy + 2 * pad2 - KW2 + 1
    assert N == Ny and (Hout, Wout) == (Hout2, Wout2), \
        "cat along channels requires matching N and output spatial dims"
    HWo = Hout * Wout
    K1 = KH1 * KW1 * Cin1
    K2 = KH2 * KW2 * Cin2
    Ktot = K1 + K2
    Ctot = C1 + C2

    # ---- wrapper-side glue (padding, im2col, weight fusion) in plain JAX ----
    def im2col(inp, pad, KH, KW):
        # inp: (N, Cin, H, W) -> (N, KH*KW*Cin, Hout*Wout), Kdim ordered (kh, kw, cin)
        xp = jnp.pad(inp, ((0, 0), (0, 0), (pad, pad), (pad, pad)))
        taps = [xp[:, :, kh:kh + Hout, kw:kw + Wout]
                for kh in range(KH) for kw in range(KW)]
        slab = jnp.stack(taps, axis=1)              # (N, KH*KW, Cin, Hout, Wout)
        return slab.reshape(N, KH * KW * inp.shape[1], HWo)

    patches = jnp.concatenate(
        [im2col(x, pad1, KH1, KW1), im2col(y, pad2, KH2, KW2)], axis=1)  # (N, Ktot, HWo)

    # Weights flattened tap-major (kh, kw, cin) to match the im2col slab, then
    # combined into a block-diagonal (Ctot, Ktot) matrix so one matmul yields
    # the already-concatenated output.
    w1f = jnp.transpose(w1, (0, 2, 3, 1)).reshape(C1, K1)
    w2f = jnp.transpose(w2, (0, 2, 3, 1)).reshape(C2, K2)
    w_cat = jnp.concatenate(
        [jnp.concatenate([w1f, jnp.zeros((C1, K2), w1f.dtype)], axis=1),
         jnp.concatenate([jnp.zeros((C2, K1), w2f.dtype), w2f], axis=1)],
        axis=0)                                     # (Ctot, Ktot)
    b_cat = jnp.concatenate([b1, b2]).reshape(Ctot, 1)

    out_flat = pl.pallas_call(
        _catconv_kernel,
        out_shape=jax.ShapeDtypeStruct((N, Ctot, HWo), x.dtype),
        grid=(N,),
        in_specs=[
            pl.BlockSpec((1, Ktot, HWo), lambda n: (n, 0, 0)),
            pl.BlockSpec((Ctot, Ktot), lambda n: (0, 0)),
            pl.BlockSpec((Ctot, 1), lambda n: (0, 0)),
        ],
        out_specs=pl.BlockSpec((1, Ctot, HWo), lambda n: (n, 0, 0)),
        compiler_params=pltpu.CompilerParams(
            dimension_semantics=("parallel",)),
    )(patches, w_cat, b_cat)

    return out_flat.reshape(N, Ctot, Hout, Wout)


def _reference(x, y, w1, b1, w2, b2, pad1=1, pad2=1):
    """Pure-JAX reference (mirrors F.conv2d + torch.cat)."""
    dn = jax.lax.conv_dimension_numbers(x.shape, w1.shape,
                                        ("NCHW", "OIHW", "NCHW"))
    o1 = jax.lax.conv_general_dilated(x, w1, (1, 1),
                                      [(pad1, pad1), (pad1, pad1)],
                                      dimension_numbers=dn)
    o1 = o1 + b1[None, :, None, None]
    o2 = jax.lax.conv_general_dilated(y, w2, (1, 1),
                                      [(pad2, pad2), (pad2, pad2)],
                                      dimension_numbers=dn)
    o2 = o2 + b2[None, :, None, None]
    return jnp.concatenate([o1, o2], axis=1)


if __name__ == "__main__":
    # conv1 = nn.Conv2d(4, 8, 3, padding=1); conv2 = nn.Conv2d(4, 6, 3, padding=1)
    N, Cin, H, W = 2, 4, 16, 16
    C1, C2, K = 8, 6, 3

    key = jax.random.PRNGKey(0)
    kx, ky, kw1, kb1, kw2, kb2 = jax.random.split(key, 6)
    x = jax.random.normal(kx, (N, Cin, H, W), jnp.float32)
    y = jax.random.normal(ky, (N, Cin, H, W), jnp.float32)
    w1 = jax.random.normal(kw1, (C1, Cin, K, K), jnp.float32) * 0.1
    b1 = jax.random.normal(kb1, (C1,), jnp.float32) * 0.1
    w2 = jax.random.normal(kw2, (C2, Cin, K, K), jnp.float32) * 0.1
    b2 = jax.random.normal(kb2, (C2,), jnp.float32) * 0.1

    out = cat_conv(x, y, w1, b1, w2, b2, pad1=1, pad2=1)
    out = jax.block_until_ready(out)

    ref = jax.block_until_ready(_reference(x, y, w1, b1, w2, b2))
    assert out.shape == (N, C1 + C2, H, W), out.shape
    assert jnp.allclose(out, ref, rtol=1e-4, atol=1e-4), \
        float(jnp.max(jnp.abs(out - ref)))

    print("KERNEL_OK")
</pallas_src>

<mosaic_0001>
module attributes {stable_mosaic.version = 11 : i64} {
  func.func @_catconv_kernel(%arg0: i32, %arg1: memref<1x72x256xf32, #tpu.memory_space<vmem>>, %arg2: memref<14x72xf32, #tpu.memory_space<vmem>>, %arg3: memref<14x1xf32, #tpu.memory_space<vmem>>, %arg4: memref<1x14x256xf32, #tpu.memory_space<vmem>>) attributes {dimension_semantics = [#tpu.dimension_semantics<parallel>], iteration_bounds = array<i64: 2>, scalar_prefetch = 0 : i64, scratch_operands = 0 : i64, tpu.core_type = #tpu.core_type<tc>, window_params = [{transform_indices = @transform_0, window_bounds = array<i64: 1, 72, 256>}, {pipeline_mode = #tpu.pipeline_mode<synchronous>, transform_indices = @transform_1, window_bounds = array<i64: 14, 72>}, {pipeline_mode = #tpu.pipeline_mode<synchronous>, transform_indices = @transform_2, window_bounds = array<i64: 14, 1>}, {transform_indices = @transform_3, window_bounds = array<i64: 1, 14, 256>}]} {
    %c0 = arith.constant 0 : index
    %c0_0 = arith.constant 0 : index
    %c0_1 = arith.constant 0 : index
    %0 = vector.load %arg1[%c0, %c0_0, %c0_1] : memref<1x72x256xf32, #tpu.memory_space<vmem>>, vector<1x72x256xf32>
    %1 = vector.shape_cast %0 : vector<1x72x256xf32> to vector<72x256xf32>
    %c0_2 = arith.constant 0 : index
    %c0_3 = arith.constant 0 : index
    %2 = vector.load %arg2[%c0_2, %c0_3] : memref<14x72xf32, #tpu.memory_space<vmem>>, vector<14x72xf32>
    %cst = arith.constant dense<0.000000e+00> : vector<14x256xf32>
    %3 = tpu.matmul %2, %1, %cst {dimension_numbers = #tpu.dot_dimension_numbers<[1], [0], [0], [1], [0, 0, 1, 1], [], []>} : vector<14x72xf32>, vector<72x256xf32>, vector<14x256xf32> -> vector<14x256xf32>
    %c0_4 = arith.constant 0 : index
    %c0_5 = arith.constant 0 : index
    %4 = vector.load %arg3[%c0_4, %c0_5] : memref<14x1xf32, #tpu.memory_space<vmem>>, vector<14x1xf32>
    %5 = vector.broadcast %4 : vector<14x1xf32> to vector<14x256xf32>
    %6 = arith.addf %3, %5 : vector<14x256xf32>
    %c0_6 = arith.constant 0 : index
    %c0_7 = arith.constant 0 : index
    %c0_8 = arith.constant 0 : index
    %7 = vector.load %arg4[%c0_6, %c0_7, %c0_8] : memref<1x14x256xf32, #tpu.memory_space<vmem>>, vector<1x14x256xf32>
    %8 = vector.shape_cast %7 : vector<1x14x256xf32> to vector<14x256xf32>
    %9 = vector.shape_cast %6 : vector<14x256xf32> to vector<1x14x256xf32>
    tpu.vector_store %arg4[%c0_6, %c0_7, %c0_8], %9 {strides = array<i32>} : memref<1x14x256xf32, #tpu.memory_space<vmem>>, vector<1x14x256xf32>,
    return
  }
  func.func @transform_0(%arg0: i32) -> (i32, i32, i32) {
    %c0_i32 = arith.constant 0 : i32
    %c0_i32_0 = arith.constant 0 : i32
    %c0_i32_1 = arith.constant 0 : i32
    return %arg0, %c0_i32, %c0_i32_0 : i32, i32, i32
  }
  func.func @transform_1(%arg0: i32) -> (i32, i32) {
    %c0_i32 = arith.constant 0 : i32
    %c0_i32_0 = arith.constant 0 : i32
    %c0_i32_1 = arith.constant 0 : i32
    return %c0_i32, %c0_i32_0 : i32, i32
  }
  func.func @transform_2(%arg0: i32) -> (i32, i32) {
    %c0_i32 = arith.constant 0 : i32
    %c0_i32_0 = arith.constant 0 : i32
    %c0_i32_1 = arith.constant 0 : i32
    return %c0_i32, %c0_i32_0 : i32, i32
  }
  func.func @transform_3(%arg0: i32) -> (i32, i32, i32) {
    %c0_i32 = arith.constant 0 : i32
    %c0_i32_0 = arith.constant 0 : i32
    %c0_i32_1 = arith.constant 0 : i32
    return %arg0, %c0_i32, %c0_i32_0 : i32, i32, i32
  }
}

</mosaic_0001>

<bundles_post_ra>
// kernel: tpu_custom_call.1
= control target key start
LH: loop header
LB: loop body
LE: loop exit
PB: predicated region body
PF: predicated region fallthrough
CT: control target
= control target key end

     0   :  { %8 = vsyncpa [#allocation3], 0  ;;  %s694_s0 = inlined_call_operand.hbm [shape: f32[2,72,256], index: 0, kind: input, shape index: {}]   ;;  %s695_s1 = inlined_call_operand.vmem [shape: f32[14,72], index: 1, kind: input, shape index: {}]   ;;  %s696_s2 = inlined_call_operand.vmem [shape: f32[14,1], index: 2, kind: input, shape index: {}]   ;;  %s697_s3 = inlined_call_operand.vmem [shape: f32[2,14,256], index: 3, kind: output, shape index: {}]  }
   0x1   :  { %10 = vsyncpa [#allocation3 + $0x1], 0  ;;  %s554_s12 = smov 0   ;;  %s556_s13 = smov 0  }
   0x2   :  { %s558_s14 = smov 0   ;;  %s560_s15 = smov 0  }
   0x3 LB: > { %s573_s16 = sadd.s32 4294967295, %s527_s15   ;;  %s576_s17 = sadd.s32 1, %s527_s15   ;;  %s527_s15 = sphi %s560_s15, %s704_s15   ;;  %s523_s14 = sphi %s558_s14, %s703_s14   ;;  %s519_s13 = sphi %s556_s13, %s702_s13   ;;  %s515_s12 = sphi %s554_s12, %s701_s12  }
   0x4   : > { %s20_s18 = ssub.s32 %s527_s15, %s576_s17  ;;  %s23_s19 = sadd.s32 1, %s523_s14 }
   0x5   : > { %p21_p0 = scmp.eq.s32.totalorder %s20_s18, 0  ;;  %p30_p1 = scmp.ne.s32.totalorder %s523_s14, %s519_s13 }
   0x6   : > { %p31_p2 = scmp.eq.s32.totalorder %s527_s15, 0  ;;  %p36_p3 = scmp.ne.s32.totalorder %s519_s13, %s515_s12 }
   0x7   : > { %s586_s20 = scalar_select %p21_p0, %s523_s14, %s23_s19  }
   0x8   : > { %p32_p4 = por %p31_p2, %p30_p1  ;;  %p37_p5 = scmp.eq.s32.totalorder %s573_s16, 0 }
   0x9   : > { %p425_p6 = scmp.lt.s32.totalorder %s527_s15, 2  ;;  %s134_s22 = sand.u32 1, %s523_s14  }
   0xa   : > { %p590_p7 = por %p37_p5, %p36_p3  ;;  %s416_s23 = smul.u32 144, %s134_s22 }
   0xb   : > { %s417_s24 = smul.u32 2304, %s527_s15  ;;  %p596_p8 = pnand %p425_p6, %p32_p4 }
   0xc   : > { %s138_s29 = scalar_lea.vmem [#allocation2], %s416_s23  ;;  %s608_s4 = scalar_lea.sflag [#allocation3], %s134_s22 }
   0xd   : > { %s603_s28 = scalar_lea.hbm %s694_s0, %s417_s24  ;;  %s145_s30 = sshll.u32 %s138_s29, 4  ;;  %s605_s30 = int_to_ptr.vmem [resolvable:$true] %s145_s30 }
   0xe   : > { %s463_s5 = scalar_lea.hbm %s603_s28, 2304  ;;  %p465_p11 = pneg %p596_p8 }
   0xf   : > { %p464_p10 = scmp.ne.s32.totalorder %s603_s28, %s463_s5  ;;  %s468_s8 = scalar_lea.hbm %s694_s0, 4608 }
  0x10   : > { %p469_p0 = scmp.lt.u32.totalorder %s603_s28, %s694_s0  ;;  %p470_p1 = scmp.lt.u32.totalorder %s468_s8, %s463_s5 }
  0x11   : > { %p466_p12 = pnand %p465_p11, %p464_p10  ;;  %p472_p3 = scmp.lt.u32.totalorder %s463_s5, %s603_s28 }
  0x12   : > { %p471_p2 = por %p470_p1, %p469_p0 }
  0x13   : > { %p467_p13 = pneg %p466_p12 }
  0x14   : > { %p473_p4 = por %p472_p3, %p471_p2 }
  0x16   : > { %p474_p5 = pnand %p473_p4, %p467_p13 }
  0x18   : > { %477 = shalt.err (!%p474_p5)
}
  0x19   : > { %s478_s11 = scalar_lea.vmem %s605_s30, 2304  ;;  %s529_s12 = smov [#allocation2]  }
  0x1a   : > { %p479_p6 = scmp.ne.s32.totalorder %s605_s30, %s478_s11  ;;  %s483_s18 = sshll.u32 %s529_s12, 4  ;;  %s484_s18 = int_to_ptr.vmem [resolvable:$false] %s483_s18 }
  0x1b   : > { %s485_s19 = scalar_lea.vmem %s484_s18, 4608  ;;  %p486_p9 = scmp.lt.s32.totalorder %s605_s30, %s484_s18 }
  0x1c   : > { %p481_p10 = pnand %p479_p6, %p465_p11  ;;  %p487_p0 = scmp.lt.s32.totalorder %s485_s19, %s478_s11 }
  0x1e   : > { %p482_p12 = pneg %p481_p10  ;;  %p488_p1 = por %p487_p0, %p486_p9 }
  0x20   : > { %p489_p2 = pnand %p488_p1, %p482_p12 }
  0x22   : > { %492 = shalt.err (!%p489_p2)
}
  0x23   : > { %s530_s22 = smov 256   ;;  %s531_s23 = smov 16  }
  0x24   : > { %424 = dma.hbm_to_vmem [thread:$0]  (!%p596_p8), %s603_s28, 2304, %s605_s30, %s608_s4, %s530_s22, %s530_s22, %s531_s23  }
  0x25   : > { %p153_p11 = scmp.lt.s32.totalorder %s527_s15, 3  ;;  %p700_p13 = scmp.ge.s32.totalorder %s527_s15, 1 }
  0x27   : > { %p154_p3 = pnand %p700_p13, %p153_p11 }
  0x28   : > { %s159_s24 = sand.u32 (!%p154_p3), 1, %s519_s13  }
  0x29   : > { %157 = sbr.rel (%p154_p3) target bundleno = 286 (0x11e), region = 32  ;;  %s160_s27 = scalar_lea.sflag (!%p154_p3), [#allocation3], %s159_s24 }
  0x2a   : > { %s418_s26 = smul.u32 (!%p154_p3), 144, %s159_s24 }
  0x2c   : > { %s640_s29 = scalar_lea.vmem (!%p154_p3), [#allocation2], %s418_s26 }
  0x30   : > { %510 = dma.done.wait (%p590_p7), %s160_s27, 2304  }
  0x31   : > { %512 = vsyncadd (%p590_p7), %s160_s27, 4294964992  ;;  %v532_v0 = vmov 0.0   ;;  %v533_v1 = vmov 0   ;;  %v192_v2 = vld [vmem:[%s640_s29 + $0x8] sm:$0xff]  ;;  %v194_v3 = vld [vmem:[%s640_s29 + $0x18] sm:$0xff]  ;;  %vm223_vm0 = vcmask 588800  }
  0x32   : > { %294 = vmatprep.mubr.f32.mxu0 %v532_v0  ;;  %300 = vmatprep.mubr.f32.mxu1 %v532_v0  ;;  %v191_v4 = vld [vmem:[%s640_s29] sm:$0xff]  ;;  %v390_v5 = vpack.c.bf16 %v194_v3, %v192_v2  ;;  %v193_v6 = vld [vmem:[%s640_s29 + $0x10] sm:$0xff]  ;;  %v196_v7 = vld [vmem:[%s640_s29 + $0x28] sm:$0xff]  ;;  %p186_p7 = scmp.lt.s32.totalorder %s573_s16, 1 }
  0x33   : > { %462 = vset.pattern.permute.xlu0 %v533_v1  ;;  %v198_v8 = vld [vmem:[%s640_s29 + $0x38] sm:$0xff]  ;;  %v392_v9 = vpack.c.bf16 %v193_v6, %v191_v4  ;;  %v195_v11 = vld [vmem:[%s640_s29 + $0x20] sm:$0xff]  ;;  %v197_v12 = vld [vmem:[%s640_s29 + $0x30] sm:$0xff] }
  0x34   : > { %v394_v10 = vpack.c.bf16 %v198_v8, %v196_v7  ;;  %v200_v13 = vld [vmem:[%s640_s29 + $0x48] sm:$0xff]  ;;  %391 = vmatprep.subr.bf16.mxu0 %v390_v5  ;;  %406 = vmatprep.subr.bf16.mxu1 %v390_v5  ;;  %v202_v14 = vld [vmem:[%s640_s29 + $0x58] sm:$0xff]  ;;  %v396_v15 = vpack.c.bf16 %v197_v12, %v195_v11  ;;  %v199_v17 = vld [vmem:[%s640_s29 + $0x40] sm:$0xff]  ;;  %s706_s16 = smov (!%p186_p7, %s573_s16), 1 }
  0x35   : > { %393 = vmatpush1.bf16.msra.mxu0 %v392_v9  ;;  %411 = vmatpush1.bf16.msra.mxu1 %v392_v9  ;;  %v398_v16 = vpack.c.bf16 %v202_v14, %v200_v13  ;;  %v201_v18 = vld [vmem:[%s640_s29 + $0x50] sm:$0xff]  ;;  %v204_v19 = vld [vmem:[%s640_s29 + $0x68] sm:$0xff]  ;;  %v206_v20 = vld [vmem:[%s640_s29 + $0x78] sm:$0xff]  ;;  %s389_s7 = sshll.u32 %s706_s16, 5 }
  0x36   : > { %395 = vmatprep.subr.bf16.mxu0 %v394_v10  ;;  %407 = vmatprep.subr.bf16.mxu1 %v394_v10  ;;  %v211_v21 = vld [vmem:[%s696_s2] sm:$0xff]  ;;  %v400_v22 = vpack.c.bf16 %v201_v18, %v199_v17  ;;  %v212_v23 = vld [vmem:[%s696_s2 + $0x8] sm:$0x3f]  ;;  %v402_v24 = vpack.c.bf16 %v206_v20, %v204_v19  ;;  %s190_s10 = scalar_lea.vmem %s697_s3, %s389_s7 }
  0x37   : > { %215 = vperm.xlu0 %462, %v211_v21   ;;  %v203_v25 = vld [vmem:[%s640_s29 + $0x60] sm:$0xff]  ;;  %v205_v26 = vld [vmem:[%s640_s29 + $0x70] sm:$0xff]  ;;  %v208_v28 = vld [vmem:[%s640_s29 + $0x88] sm:$0xff] }
  0x38   : > { %v404_v27 = vpack.c.bf16 %v205_v26, %v203_v25  ;;  %v207_v29 = vld [vmem:[%s640_s29 + $0x80] sm:$0xff]  ;;  %v210_v31 = vld [vmem:[%s695_s1 + $0x8] sm:$0x3f] }
  0x39   : > { %397 = vmatpush1.bf16.msra.mxu0 %v396_v15  ;;  %412 = vmatpush1.bf16.msra.mxu1 %v396_v15  ;;  %v209_v30 = vld [vmem:[%s695_s1] sm:$0xff] }
  0x3a   : > { %399 = vmatprep.subr.bf16.mxu0 %v398_v16  ;;  %408 = vmatprep.subr.bf16.mxu1 %v398_v16 }
  0x3b   : > { %220 = vperm.xlu0 %462, %v212_v23  }
  0x3d   : > { %401 = vmatpush1.bf16.msra.mxu0 %v400_v22  ;;  %413 = vmatpush1.bf16.msra.mxu1 %v400_v22 }
  0x3e   : > { %403 = vmatprep.subr.bf16.mxu0 %v402_v24  ;;  %409 = vmatprep.subr.bf16.mxu1 %v402_v24 }
  0x41   : > { %405 = vmatpush1.bf16.msra.mxu0 %v404_v27  ;;  %414 = vmatpush1.bf16.msra.mxu1 %v404_v27 }
  0x42   : > { %246 = vmatprep.subr.mxu0 %v208_v28  ;;  %410 = vmatprep.subr.mxu1 %v208_v28 }
  0x45   : > { %247 = vmatpush1.msra.mxu0 %v207_v29  ;;  %415 = vmatpush1.msra.mxu1 %v207_v29 }
  0x46   : > { %385 = vmatmul.mubr.msk.f32.vlgmr.msra.gmra.mrb[0].mxu0 %vm223_vm0, %v209_v30  ;;  %386 = vmatmul.mubr.msk.f32.vlgmr.msra.gmra.mrb[0].mxu1 %vm223_vm0, %v210_v31 }
  0xb6   : > { %v216_v32 = vpop.permute.xlu0 %215 }
  0xba   : > { %v221_v33 = vpop.permute.xlu0 %220 }
 0x119   : > { %v296_v34 = vpop.f32.mrb[0].mxu0  ;;  %v302_v35 = vpop.f32.mrb[0].mxu1 }
 0x11a   : > { %v297_v36 = vadd.f32 %v296_v34, %v216_v32  ;;  %v303_v37 = vadd.f32 %v302_v35, %v221_v33  ;;  %v298_v38 = vpop.f32.mrb[1].mxu0  ;;  %v304_v39 = vpop.f32.mrb[1].mxu1 }
 0x11b   : > { %v299_v40 = vadd.f32 %v298_v38, %v216_v32  ;;  %v305_v41 = vadd.f32 %v304_v39, %v221_v33 }
 0x11c   : > { %307 = vst [vmem:[%s190_s10] sm:$0xff] %v297_v36  ;;  %309 = vst [vmem:[%s190_s10 + $0x10] sm:$0x3f] %v303_v37 }
 0x11d   : > { %308 = vst [vmem:[%s190_s10 + $0x8] sm:$0xff] %v299_v40  ;;  %310 = vst [vmem:[%s190_s10 + $0x18] sm:$0x3f] %v305_v41 }
 0x11e PF: > { %p13_p8 = scmp.ge.s32.totalorder %s576_s17, 4   ;;  %s701_s12 = smov %s519_s13 }
 0x11f   : > { %s702_s13 = smov %s523_s14  ;;  %s703_s14 = smov %s586_s20 }
 0x120   : > { %s704_s15 = smov %s576_s17  ;;  %15 = sbr.rel (!%p13_p8) target bundleno = 3 (0x3), region = 72 }
 0x127   :  { %332 = vsyncpa [#allocation3], 1 }
 0x128   :  { %334 = vsyncpa [#allocation3 + $0x1], 1 }

</bundles_post_ra>
